<compile_context>
chip_gen: v5e
topology: v5e:2x2
jax: 0.10.0
libtpu: 0.0.40
codegen_flags: <defaults>
</compile_context>

<pallas_src>
import functools
import itertools

import numpy as np
import jax
import jax.numpy as jnp
from jax.experimental import pallas as pl
from jax.experimental.pallas import tpu as pltpu

WINDOW_SIZE = (7, 7, 7)          # MONAI SwinUNETR hard-codes window_size = 7
NUM_HEADS = (3, 6, 12, 24)       # depths = (2, 2, 2, 2)


def _round_up(x, m):
    return (x + m - 1) // m * m


def _device_kind():
    try:
        return jax.devices()[0].device_kind.lower()
    except Exception:
        return ""


_KIND = _device_kind()
# v5e and older MXUs are 128-wide; v6e / v7x are 256-wide -> bigger output tiles.
_MM_TILE = 128 if any(t in _KIND for t in ("v2", "v3", "v4", "v5")) else 256


def _vmem_limit_bytes():
    cap = None
    try:
        cap = int(pltpu.get_tpu_info().vmem_capacity_bytes)
    except Exception:
        cap = None
    if cap is None:
        cap = 64 * 1024 * 1024 if "7" in _KIND else 128 * 1024 * 1024
    # ~3/4 of physical VMEM, never above 100 MiB (=> ~48 MiB on v7x, ~96 MiB on v5e/v6e)
    return min(100 * 1024 * 1024, (cap * 3) // 4)


_VMEM_LIMIT = _vmem_limit_bytes()


def _compiler_params(semantics):
    return pltpu.CompilerParams(dimension_semantics=semantics,
                                vmem_limit_bytes=_VMEM_LIMIT)


# ---------------------------------------------------------------------------
# Pallas kernels: matmul (+ fused bias / activation epilogue)
# ---------------------------------------------------------------------------
def _apply_act(x, activation):
    if activation == "relu":
        return jnp.maximum(x, 0.0)
    if activation == "leaky_relu":
        return jnp.where(x >= 0, x, 0.01 * x)
    return x


def _mm_kernel(a_ref, b_ref, o_ref, *, activation):
    acc = jnp.dot(a_ref[...], b_ref[...], preferred_element_type=jnp.float32)
    o_ref[...] = _apply_act(acc, activation).astype(o_ref.dtype)


def _mm_bias_kernel(a_ref, b_ref, bias_ref, o_ref, *, activation):
    acc = jnp.dot(a_ref[...], b_ref[...], preferred_element_type=jnp.float32)
    acc = acc + bias_ref[...]
    o_ref[...] = _apply_act(acc, activation).astype(o_ref.dtype)


@functools.partial(jax.jit, static_argnames=("activation",))
def _pallas_matmul(a, b, bias, *, activation):
    """(M, K) @ (K, N) [+ bias] [-> act] with bf16 operands, fp32 accumulation.

    Whole K is one block (no K padding / K grid axis); M is padded only up to a
    multiple of 8 when needed; M/N use cdiv partial blocks (masked stores).
    """
    M, K = a.shape
    K2, N = b.shape
    assert K == K2
    a = a.astype(jnp.bfloat16)
    b = b.astype(jnp.bfloat16)
    Mp = _round_up(M, 8)
    if Mp != M:
        a = jnp.pad(a, ((0, Mp - M), (0, 0)))
    tm = min(_MM_TILE, Mp)
    tn = N if N <= _MM_TILE else _MM_TILE
    grid = (pl.cdiv(Mp, tm), pl.cdiv(N, tn))

    in_specs = [pl.BlockSpec((tm, K), lambda i, j: (i, 0)),
                pl.BlockSpec((K, tn), lambda i, j: (0, j))]
    args = [a, b]
    if bias is not None:
        in_specs.append(pl.BlockSpec((1, tn), lambda i, j: (0, j)))
        args.append(bias.reshape(1, N).astype(jnp.float32))
        kernel = functools.partial(_mm_bias_kernel, activation=activation)
    else:
        kernel = functools.partial(_mm_kernel, activation=activation)

    out = pl.pallas_call(
        kernel,
        out_shape=jax.ShapeDtypeStruct((Mp, N), jnp.float32),
        grid=grid,
        in_specs=in_specs,
        out_specs=pl.BlockSpec((tm, tn), lambda i, j: (i, j)),
        compiler_params=_compiler_params(("parallel", "parallel")),
    )(*args)
    return out[:M] if Mp != M else out


def pallas_matmul(a, b, bias=None, activation=None):
    return _pallas_matmul(a, b, bias, activation=activation)


def linear(x2d, w, b=None):
    return pallas_matmul(x2d, w, bias=b)


# ---------------------------------------------------------------------------
# Pallas kernels: layer norm
# ---------------------------------------------------------------------------
def _layernorm_kernel(x_ref, w_ref, b_ref, o_ref):
    x = x_ref[...]
    mu = jnp.mean(x, axis=-1, keepdims=True)
    var = jnp.mean((x - mu) ** 2, axis=-1, keepdims=True)
    y = (x - mu) * jax.lax.rsqrt(var + 1e-5)
    o_ref[...] = (y * w_ref[...] + b_ref[...]).astype(o_ref.dtype)


@jax.jit
def pallas_layernorm(x2d, w, b):
    M, C = x2d.shape
    x2d = x2d.astype(jnp.float32)
    Mp = _round_up(M, 8)
    if Mp != M:
        x2d = jnp.pad(x2d, ((0, Mp - M), (0, 0)))
    max_rows = max(8, ((1 << 21) // (4 * C)) // 8 * 8)      # ~2 MiB per block
    tm = min(1024, Mp, max_rows)
    out = pl.pallas_call(
        _layernorm_kernel,
        out_shape=jax.ShapeDtypeStruct((Mp, C), jnp.float32),
        grid=(pl.cdiv(Mp, tm),),
        in_specs=[pl.BlockSpec((tm, C), lambda i: (i, 0)),
                  pl.BlockSpec((1, C), lambda i: (0, 0)),
                  pl.BlockSpec((1, C), lambda i: (0, 0))],
        out_specs=pl.BlockSpec((tm, C), lambda i: (i, 0)),
        compiler_params=_compiler_params(("parallel",)),
    )(x2d, w.reshape(1, C).astype(jnp.float32), b.reshape(1, C).astype(jnp.float32))
    return out[:M] if Mp != M else out


# ---------------------------------------------------------------------------
# Pallas kernels: instance norm (two-pass, chunked over the spatial axis)
# ---------------------------------------------------------------------------
def _in_stats_kernel(x_ref, sum_ref, ssq_ref):
    @pl.when(pl.program_id(1) == 0)
    def _():
        sum_ref[...] = jnp.zeros_like(sum_ref)
        ssq_ref[...] = jnp.zeros_like(ssq_ref)

    x = x_ref[...]                                       # (1, ts, C)
    sum_ref[...] += jnp.sum(x, axis=1, keepdims=True)
    ssq_ref[...] += jnp.sum(x * x, axis=1, keepdims=True)


def _in_apply_kernel(x_ref, sum_ref, ssq_ref, o_ref, *, count, apply_act):
    inv = 1.0 / count
    mu = sum_ref[...] * inv                              # (1, 1, C)
    var = ssq_ref[...] * inv - mu * mu
    y = (x_ref[...] - mu) * jax.lax.rsqrt(var + 1e-5)
    if apply_act:                                        # fused LeakyReLU(0.01)
        y = jnp.where(y >= 0, y, 0.01 * y)
    o_ref[...] = y.astype(o_ref.dtype)


@functools.partial(jax.jit, static_argnames=("apply_act",))
def _instance_norm_flat(x3, *, apply_act):
    B, S, C = x3.shape
    x3 = x3.astype(jnp.float32)
    ts = min(S, max(8, ((1 << 21) // (4 * C)) // 8 * 8))   # ~2 MiB chunks
    Sp = _round_up(S, ts)
    xw = jnp.pad(x3, ((0, 0), (0, Sp - S), (0, 0))) if Sp != S else x3
    nchunks = Sp // ts

    sums, ssqs = pl.pallas_call(
        _in_stats_kernel,
        out_shape=(jax.ShapeDtypeStruct((B, 1, C), jnp.float32),
                   jax.ShapeDtypeStruct((B, 1, C), jnp.float32)),
        grid=(B, nchunks),
        in_specs=[pl.BlockSpec((1, ts, C), lambda b, s: (b, s, 0))],
        out_specs=(pl.BlockSpec((1, 1, C), lambda b, s: (b, 0, 0)),
                   pl.BlockSpec((1, 1, C), lambda b, s: (b, 0, 0))),
        compiler_params=_compiler_params(("parallel", "arbitrary")),
    )(xw)

    return pl.pallas_call(
        functools.partial(_in_apply_kernel, count=float(S), apply_act=apply_act),
        out_shape=jax.ShapeDtypeStruct((B, S, C), jnp.float32),
        grid=(B, nchunks),
        in_specs=[pl.BlockSpec((1, ts, C), lambda b, s: (b, s, 0)),
                  pl.BlockSpec((1, 1, C), lambda b, s: (b, 0, 0)),
                  pl.BlockSpec((1, 1, C), lambda b, s: (b, 0, 0))],
        out_specs=pl.BlockSpec((1, ts, C), lambda b, s: (b, s, 0)),
        compiler_params=_compiler_params(("parallel", "parallel")),
    )(xw, sums, ssqs)


def instance_norm_act(x, *, apply_act):
    """InstanceNorm3d (affine=False, eps=1e-5), optional fused LeakyReLU."""
    B, D, H, W, C = x.shape
    return _instance_norm_flat(x.reshape(B, D * H * W, C),
                               apply_act=apply_act).reshape(x.shape)


# ---------------------------------------------------------------------------
# Pallas kernels: windowed self-attention (all heads per grid step)
# ---------------------------------------------------------------------------
def _win_attn_kernel(*refs, scale, heads, hd, dim, has_mask):
    if has_mask:
        qkv_ref, bias_ref, mask_ref, o_ref = refs
    else:
        qkv_ref, bias_ref, o_ref = refs
        mask_ref = None
    qkv = qkv_ref[0]                                     # (N, 3C) bf16
    mask = mask_ref[0] if has_mask else None             # (N, N)  f32
    outs = []
    for h in range(heads):                               # static unroll over heads
        q = qkv[:, h * hd:(h + 1) * hd] * scale
        k = qkv[:, dim + h * hd:dim + (h + 1) * hd]
        v = qkv[:, 2 * dim + h * hd:2 * dim + (h + 1) * hd]
        s = jax.lax.dot_general(q, k, (((1,), (1,)), ((), ())),
                                preferred_element_type=jnp.float32)   # (N, N)
        s = s + bias_ref[h]
        if has_mask:
            s = s + mask
        s = s - jnp.max(s, axis=-1, keepdims=True)
        p = jnp.exp(s)
        p = p * pl.reciprocal(jnp.sum(p, axis=-1, keepdims=True), approx=True)
        outs.append(jnp.dot(p.astype(jnp.bfloat16), v,
                            preferred_element_type=jnp.float32).astype(o_ref.dtype))
    o_ref[0] = jnp.concatenate(outs, axis=-1)            # lane-dense (N, C)


@functools.partial(jax.jit, static_argnames=("num_heads", "scale", "has_mask"))
def _pallas_window_attention(qkv, bias, mask, *, num_heads, scale, has_mask):
    BW, N, C3 = qkv.shape
    C = C3 // 3
    hd = C // num_heads
    kernel = functools.partial(_win_attn_kernel, scale=scale, heads=num_heads,
                               hd=hd, dim=C, has_mask=has_mask)
    in_specs = [pl.BlockSpec((1, N, C3), lambda b: (b, 0, 0)),
                pl.BlockSpec((num_heads, N, N), lambda b: (0, 0, 0))]
    args = [qkv, bias]
    if has_mask:
        nw = mask.shape[0]
        in_specs.append(pl.BlockSpec((1, N, N), lambda b: (b % nw, 0, 0)))
        args.append(mask)
    return pl.pallas_call(
        kernel,
        out_shape=jax.ShapeDtypeStruct((BW, N, C), jnp.bfloat16),
        grid=(BW,),
        in_specs=in_specs,
        out_specs=pl.BlockSpec((1, N, C), lambda b: (b, 0, 0)),
        compiler_params=_compiler_params(("parallel",)),
    )(*args)


# ---------------------------------------------------------------------------
# Conv / norm building blocks (glue around the Pallas kernels)
# ---------------------------------------------------------------------------
def _im2col_3x3(x):
    """3x3x3 stride-1 pad-1 patches, built directly in bf16.

    TODO(synk): fuse the 27 taps into the matmul's K grid axis (element-offset
    BlockSpecs on the padded volume) to avoid materializing the patch matrix.
    """
    B, D, H, W, C = x.shape
    xp = jnp.pad(x.astype(jnp.bfloat16), ((0, 0), (1, 1), (1, 1), (1, 1), (0, 0)))
    taps = [xp[:, kd:kd + D, kh:kh + H, kw:kw + W, :]
            for kd, kh, kw in itertools.product(range(3), repeat=3)]
    return jnp.concatenate(taps, axis=-1).reshape(B * D * H * W, 27 * C)


def conv3d_3x3(x, w, b=None, activation=None):
    """3x3x3, stride 1, pad 1.  x: (B,D,H,W,Cin), w: (27*Cin, Cout)."""
    B, D, H, W, C = x.shape
    y = pallas_matmul(_im2col_3x3(x), w, bias=b, activation=activation)
    return y.reshape(B, D, H, W, -1)


def conv3d_1x1(x, w, b=None, activation=None):
    B, D, H, W, C = x.shape
    y = pallas_matmul(x.reshape(-1, C), w, bias=b, activation=activation)
    return y.reshape(B, D, H, W, -1)


def conv3d_2x2_s2(x, w, b=None):
    """2x2x2 conv, stride 2 (patch embedding)."""
    B, D, H, W, C = x.shape
    x = x.reshape(B, D // 2, 2, H // 2, 2, W // 2, 2, C)
    x = x.transpose(0, 1, 3, 5, 2, 4, 6, 7).reshape(-1, 8 * C)
    return pallas_matmul(x, w, bias=b).reshape(B, D // 2, H // 2, W // 2, -1)


def transp_conv3d_2x2_s2(x, w):
    """ConvTranspose3d kernel=2 stride=2 (no bias).  w: (Cin, 8*Cout)."""
    B, D, H, W, C = x.shape
    cout = w.shape[1] // 8
    y = pallas_matmul(x.reshape(-1, C), w).reshape(B, D, H, W, 2, 2, 2, cout)
    return y.transpose(0, 1, 4, 2, 5, 3, 6, 7).reshape(B, 2 * D, 2 * H, 2 * W, cout)


def leaky_relu(x, slope=0.01):
    return jnp.where(x >= 0, x, slope * x)


def unet_res_block(x, p):
    """MONAI UnetResBlock (kernel 3, stride 1, instance norm, LeakyReLU 0.01)."""
    residual = x
    out = conv3d_3x3(x, p["conv1_w"])
    out = instance_norm_act(out, apply_act=True)
    out = conv3d_3x3(out, p["conv2_w"])
    out = instance_norm_act(out, apply_act=False)
    if "conv3_w" in p:                     # downsample path when Cin != Cout
        residual = conv3d_1x1(residual, p["conv3_w"])
        residual = instance_norm_act(residual, apply_act=False)
    return leaky_relu(out + residual)


def unetr_up_block(x, skip, p):
    up = transp_conv3d_2x2_s2(x, p["up_w"])
    out = jnp.concatenate([up, skip], axis=-1)
    return unet_res_block(out, p["res"])


# ---------------------------------------------------------------------------
# Swin transformer backbone
# ---------------------------------------------------------------------------
def _rel_pos_index(ws=WINDOW_SIZE):
    coords = np.stack(np.meshgrid(np.arange(ws[0]), np.arange(ws[1]),
                                  np.arange(ws[2]), indexing="ij"))
    cf = coords.reshape(3, -1)
    rel = (cf[:, :, None] - cf[:, None, :]).transpose(1, 2, 0).astype(np.int64)
    rel[:, :, 0] += ws[0] - 1
    rel[:, :, 1] += ws[1] - 1
    rel[:, :, 2] += ws[2] - 1
    rel[:, :, 0] *= (2 * ws[1] - 1) * (2 * ws[2] - 1)
    rel[:, :, 1] *= (2 * ws[2] - 1)
    return rel.sum(-1)                    # (343, 343)


REL_INDEX = _rel_pos_index()


def get_window_size(x_size, window_size, shift_size):
    use_ws, use_ss = list(window_size), list(shift_size)
    for i in range(len(x_size)):
        if x_size[i] <= window_size[i]:
            use_ws[i] = x_size[i]
            use_ss[i] = 0
    return tuple(use_ws), tuple(use_ss)


def window_partition(x, ws):
    B, D, H, W, C = x.shape
    x = x.reshape(B, D // ws[0], ws[0], H // ws[1], ws[1], W // ws[2], ws[2], C)
    return x.transpose(0, 1, 3, 5, 2, 4, 6, 7).reshape(-1, ws[0] * ws[1] * ws[2], C)


def window_reverse(win, ws, dims):
    B, D, H, W = dims
    x = win.reshape(B, D // ws[0], H // ws[1], W // ws[2], ws[0], ws[1], ws[2], -1)
    return x.transpose(0, 1, 4, 2, 5, 3, 6, 7).reshape(B, D, H, W, -1)


def _window_partition_np(x, ws):
    B, D, H, W, C = x.shape
    x = x.reshape(B, D // ws[0], ws[0], H // ws[1], ws[1], W // ws[2], ws[2], C)
    return x.transpose(0, 1, 3, 5, 2, 4, 6, 7).reshape(-1, ws[0] * ws[1] * ws[2], C)


def compute_mask_np(dims, ws, ss):
    d, h, w = dims
    img_mask = np.zeros((1, d, h, w, 1), np.float32)
    cnt = 0
    for sd in (slice(-ws[0]), slice(-ws[0], -ss[0]), slice(-ss[0], None)):
        for sh in (slice(-ws[1]), slice(-ws[1], -ss[1]), slice(-ss[1], None)):
            for sw in (slice(-ws[2]), slice(-ws[2], -ss[2]), slice(-ss[2], None)):
                img_mask[:, sd, sh, sw, :] = cnt
                cnt += 1
    mw = _window_partition_np(img_mask, ws).squeeze(-1)
    attn_mask = mw[:, None, :] - mw[:, :, None]
    return np.where(attn_mask != 0, -100.0, 0.0).astype(np.float32)


def window_attention(x_win, p, num_heads, mask_np):
    BW, N, C = x_win.shape
    hd = C // num_heads
    qkv = pallas_matmul(x_win.reshape(BW * N, C), p["qkv_w"], bias=p["qkv_b"])
    qkv = qkv.reshape(BW, N, 3 * C).astype(jnp.bfloat16)
    # NOTE: matches MONAI WindowAttention, which indexes the full 7^3 relative
    # position table with [:n, :n] even when the effective window is smaller.
    idx = REL_INDEX[:N, :N].reshape(-1)
    bias = p["rel_bias"][jnp.asarray(idx)].reshape(N, N, num_heads)
    bias = jnp.transpose(bias, (2, 0, 1)).astype(jnp.float32)     # (heads, N, N)
    scale = float(hd) ** -0.5
    if mask_np is None:
        out = _pallas_window_attention(qkv, bias, None, num_heads=num_heads,
                                       scale=scale, has_mask=False)
    else:
        mask = jnp.asarray(mask_np, jnp.float32)                  # (nw, N, N)
        out = _pallas_window_attention(qkv, bias, mask, num_heads=num_heads,
                                       scale=scale, has_mask=True)
    out = out.reshape(BW * N, C)
    return pallas_matmul(out, p["proj_w"], bias=p["proj_b"]).reshape(BW, N, C)


def mlp(x2d, p):
    h = pallas_matmul(x2d, p["fc1_w"], bias=p["fc1_b"])
    h = jax.nn.gelu(h, approximate=False)
    return pallas_matmul(h, p["fc2_w"], bias=p["fc2_b"])


def swin_block(x, p, num_heads, shift, mask_np):
    B, D, H, W, C = x.shape
    base_shift = tuple(s // 2 for s in WINDOW_SIZE) if shift else (0, 0, 0)
    ws, ss = get_window_size((D, H, W), WINDOW_SIZE, base_shift)
    shortcut = x
    xn = pallas_layernorm(x.reshape(-1, C), p["norm1_w"], p["norm1_b"]).reshape(x.shape)
    pad = [(w_ - d_ % w_) % w_ for d_, w_ in zip((D, H, W), ws)]
    xp = jnp.pad(xn, ((0, 0), (0, pad[0]), (0, pad[1]), (0, pad[2]), (0, 0)))
    Dp, Hp, Wp = D + pad[0], H + pad[1], W + pad[2]
    do_shift = any(s > 0 for s in ss)
    if do_shift:
        xp = jnp.roll(xp, shift=(-ss[0], -ss[1], -ss[2]), axis=(1, 2, 3))
        mask = mask_np
    else:
        mask = None
    x_win = window_partition(xp, ws)
    a_win = window_attention(x_win, p["attn"], num_heads, mask)
    xo = window_reverse(a_win, ws, (B, Dp, Hp, Wp))
    if do_shift:
        xo = jnp.roll(xo, shift=(ss[0], ss[1], ss[2]), axis=(1, 2, 3))
    xo = xo[:, :D, :H, :W, :]
    x = shortcut + xo
    xn2 = pallas_layernorm(x.reshape(-1, C), p["norm2_w"], p["norm2_b"])
    return x + mlp(xn2, p["mlp"]).reshape(B, D, H, W, C)


def patch_merging(x, p):
    # TODO(synk): MONAI PatchMerging uses a specific hard-coded neighbor order;
    # with synthetic weights any fixed order is equivalent.
    B, D, H, W, C = x.shape
    pads = (D % 2, H % 2, W % 2)
    if any(pads):
        x = jnp.pad(x, ((0, 0), (0, pads[0]), (0, pads[1]), (0, pads[2]), (0, 0)))
    parts = [x[:, i::2, j::2, k::2, :] for i, j, k in itertools.product(range(2), repeat=3)]
    x = jnp.concatenate(parts, axis=-1)
    B2, D2, H2, W2, C8 = x.shape
    y = pallas_layernorm(x.reshape(-1, C8), p["norm_w"], p["norm_b"])
    y = pallas_matmul(y, p["red_w"])                   # Linear(8C -> 2C, no bias)
    return y.reshape(B2, D2, H2, W2, -1)


def basic_layer(x, p, num_heads):
    B, D, H, W, C = x.shape
    ws, ss = get_window_size((D, H, W), WINDOW_SIZE, tuple(s // 2 for s in WINDOW_SIZE))
    pdims = tuple(_round_up(d_, w_) for d_, w_ in zip((D, H, W), ws))
    mask_np = compute_mask_np(pdims, ws, ss) if any(s > 0 for s in ss) else None
    x = swin_block(x, p["blocks"][0], num_heads, shift=False, mask_np=mask_np)
    x = swin_block(x, p["blocks"][1], num_heads, shift=True, mask_np=mask_np)
    return patch_merging(x, p["merge"])


def swin_vit(x, p, normalize=True):
    x0 = conv3d_2x2_s2(x, p["patch_embed_w"], p["patch_embed_b"])

    def proj_out(t):
        if not normalize:
            return t
        C = t.shape[-1]
        return pallas_layernorm(t.reshape(-1, C),
                                jnp.ones((C,), jnp.float32),
                                jnp.zeros((C,), jnp.float32)).reshape(t.shape)

    hidden = [proj_out(x0)]
    xi = x0
    for li, heads in enumerate(NUM_HEADS):
        xi = basic_layer(xi, p["layers"][li], heads)
        hidden.append(proj_out(xi))
    return hidden


# ---------------------------------------------------------------------------
# SwinUNETR feature extractor + detection head
# ---------------------------------------------------------------------------
def backbone_forward(x, P):
    hs = swin_vit(x, P["swin"], normalize=True)
    # NOTE: the torch forward computes enc0 = encoder1(x_in) but never uses it
    # for the returned (dec1, dec0); the dead full-resolution compute is skipped.
    enc1 = unet_res_block(hs[0], P["encoder2"])
    enc2 = unet_res_block(hs[1], P["encoder3"])
    enc3 = unet_res_block(hs[2], P["encoder4"])
    dec4 = unet_res_block(hs[4], P["encoder10"])
    dec3 = unetr_up_block(dec4, hs[3], P["decoder5"])
    dec2 = unetr_up_block(dec3, enc3, P["decoder4"])
    dec1 = unetr_up_block(dec2, enc2, P["decoder3"])
    dec0 = unetr_up_block(dec1, enc1, P["decoder2"])
    return dec1, dec0


def detection_head(x, P):
    # TODO(synk): exact cryoet ObjectDetectionHead internals unavailable;
    # using conv3x3 -> ReLU -> conv1x1 stacks for class / offset branches.
    # Both branches share the same im2col input, so they are fused into a
    # single GEMM (and the two 1x1 convs into one block-diagonal GEMM).
    B, D, H, W, C = x.shape
    pat = _im2col_3x3(x)                                        # (M, 27C) bf16
    w1 = jnp.concatenate([P["cls_conv1_w"], P["off_conv1_w"]], axis=1)
    b1 = jnp.concatenate([P["cls_conv1_b"], P["off_conv1_b"]])
    t = pallas_matmul(pat, w1, bias=b1, activation="relu")      # (M, ci+oi)

    ci = P["cls_conv2_w"].shape[0]
    oi = P["off_conv2_w"].shape[0]
    nc = P["cls_conv2_w"].shape[1]
    no = P["off_conv2_w"].shape[1]
    w2 = jnp.zeros((ci + oi, nc + no), jnp.float32)
    w2 = w2.at[:ci, :nc].set(P["cls_conv2_w"]).at[ci:, nc:].set(P["off_conv2_w"])
    b2 = jnp.concatenate([P["cls_conv2_b"], P["off_conv2_b"]])
    y = pallas_matmul(t, w2, bias=b2)                           # (M, nc+no)

    logits = y[:, :nc].reshape(B, D, H, W, nc)
    offsets = y[:, nc:].reshape(B, D, H, W, no)
    return logits, offsets


def swin_unetr_for_object_detection(volume_ncdhw, params):
    x = jnp.transpose(volume_ncdhw, (0, 2, 3, 4, 1)).astype(jnp.float32)  # NCDHW -> NDHWC
    fm4, fm2 = backbone_forward(x, params["backbone"])
    logits, offsets = detection_head(fm2, params["head"])
    logits = jnp.transpose(logits, (0, 4, 1, 2, 3))                       # back to NCDHW
    offsets = jnp.transpose(offsets, (0, 4, 1, 2, 3))
    # labels is None -> loss not computed (object_detection_loss not executed)
    return {"logits": [logits], "offsets": [offsets], "strides": [2],
            "loss": None, "loss_dict": None}


# ---------------------------------------------------------------------------
# Deterministic parameter construction
# ---------------------------------------------------------------------------
class _ParamGen:
    def __init__(self, seed=0):
        self._key = jax.random.PRNGKey(seed)
        self._n = 0

    def normal(self, shape, scale):
        self._n += 1
        k = jax.random.fold_in(self._key, self._n)
        return jax.random.normal(k, shape, jnp.float32) * scale

    def dense(self, shape):
        return self.normal(shape, 1.0 / float(np.sqrt(shape[0])))

    def zeros(self, shape):
        return jnp.zeros(shape, jnp.float32)

    def ones(self, shape):
        return jnp.ones(shape, jnp.float32)


def init_params(in_channels=1, feature_size=48, num_classes=5,
                intermediate_channels=48, offset_intermediate_channels=16, seed=0):
    g = _ParamGen(seed)

    def attn_p(dim, heads):
        return {"qkv_w": g.dense((dim, 3 * dim)), "qkv_b": g.zeros((3 * dim,)),
                "proj_w": g.dense((dim, dim)), "proj_b": g.zeros((dim,)),
                "rel_bias": g.normal((13 * 13 * 13, heads), 0.02)}

    def block_p(dim, heads):
        return {"norm1_w": g.ones((dim,)), "norm1_b": g.zeros((dim,)),
                "norm2_w": g.ones((dim,)), "norm2_b": g.zeros((dim,)),
                "attn": attn_p(dim, heads),
                "mlp": {"fc1_w": g.dense((dim, 4 * dim)), "fc1_b": g.zeros((4 * dim,)),
                        "fc2_w": g.dense((4 * dim, dim)), "fc2_b": g.zeros((dim,))}}

    def layer_p(dim, heads):
        return {"blocks": [block_p(dim, heads), block_p(dim, heads)],
                "merge": {"norm_w": g.ones((8 * dim,)), "norm_b": g.zeros((8 * dim,)),
                          "red_w": g.dense((8 * dim, 2 * dim))}}

    def res_p(cin, cout):
        p = {"conv1_w": g.dense((27 * cin, cout)), "conv2_w": g.dense((27 * cout, cout))}
        if cin != cout:
            p["conv3_w"] = g.dense((cin, cout))
        return p

    def up_p(cin, cout):
        return {"up_w": g.dense((cin, 8 * cout)), "res": res_p(2 * cout, cout)}

    fs = feature_size
    swin = {"patch_embed_w": g.dense((8 * in_channels, fs)),
            "patch_embed_b": g.zeros((fs,)),
            "layers": [layer_p(fs, 3), layer_p(2 * fs, 6),
                       layer_p(4 * fs, 12), layer_p(8 * fs, 24)]}

    backbone = {"swin": swin,
                "encoder1": res_p(in_channels, fs),   # kept for parameter parity
                "encoder2": res_p(fs, fs),
                "encoder3": res_p(2 * fs, 2 * fs),
                "encoder4": res_p(4 * fs, 4 * fs),
                "encoder10": res_p(16 * fs, 16 * fs),
                "decoder5": up_p(16 * fs, 8 * fs),
                "decoder4": up_p(8 * fs, 4 * fs),
                "decoder3": up_p(4 * fs, 2 * fs),
                "decoder2": up_p(2 * fs, fs)}

    head = {"cls_conv1_w": g.dense((27 * 48, intermediate_channels)),
            "cls_conv1_b": g.zeros((intermediate_channels,)),
            "cls_conv2_w": g.dense((intermediate_channels, num_classes)),
            "cls_conv2_b": g.zeros((num_classes,)),
            "off_conv1_w": g.dense((27 * 48, offset_intermediate_channels)),
            "off_conv1_b": g.zeros((offset_intermediate_channels,)),
            "off_conv2_w": g.dense((offset_intermediate_channels, 3)),
            "off_conv2_b": g.zeros((3,))}

    return {"backbone": backbone, "head": head}


# ---------------------------------------------------------------------------
if __name__ == "__main__":
    # img_size must be divisible by 32 (patch embed /2 + 4 patch mergings).
    B, C_IN, S = 1, 1, 32
    NUM_CLASSES = 5

    key = jax.random.PRNGKey(0)
    volume = jax.random.normal(key, (B, C_IN, S, S, S), jnp.float32)

    params = init_params(in_channels=C_IN, feature_size=48, num_classes=NUM_CLASSES)

    out = swin_unetr_for_object_detection(volume, params)
    logits = jax.block_until_ready(out["logits"][0])
    offsets = jax.block_until_ready(out["offsets"][0])

    assert logits.shape == (B, NUM_CLASSES, S // 2, S // 2, S // 2), logits.shape
    assert offsets.shape == (B, 3, S // 2, S // 2, S // 2), offsets.shape
    assert bool(jnp.all(jnp.isfinite(logits))) and bool(jnp.all(jnp.isfinite(offsets)))
    print("KERNEL_OK")
</pallas_src>

<mosaic_0001>
module attributes {stable_mosaic.version = 11 : i64} {
  func.func @_mm_bias_kernel(%arg0: i32, %arg1: i32, %arg2: memref<256x8xbf16, #tpu.memory_space<vmem>>, %arg3: memref<8x48xbf16, #tpu.memory_space<vmem>>, %arg4: memref<1x48xf32, #tpu.memory_space<vmem>>, %arg5: memref<256x48xf32, #tpu.memory_space<vmem>>) attributes {dimension_semantics = [#tpu.dimension_semantics<parallel>, #tpu.dimension_semantics<parallel>], iteration_bounds = array<i64: 16, 1>, scalar_prefetch = 0 : i64, scratch_operands = 0 : i64, tpu.core_type = #tpu.core_type<tc>, window_params = [{transform_indices = @transform_0, window_bounds = array<i64: 256, 8>}, {transform_indices = @transform_1, window_bounds = array<i64: 8, 48>}, {transform_indices = @transform_2, window_bounds = array<i64: 1, 48>}, {transform_indices = @transform_3, window_bounds = array<i64: 256, 48>}]} {
    %c0 = arith.constant 0 : index
    %c0_0 = arith.constant 0 : index
    %0 = vector.load %arg2[%c0, %c0_0] : memref<256x8xbf16, #tpu.memory_space<vmem>>, vector<256x8xbf16>
    %c0_1 = arith.constant 0 : index
    %c0_2 = arith.constant 0 : index
    %1 = vector.load %arg3[%c0_1, %c0_2] : memref<8x48xbf16, #tpu.memory_space<vmem>>, vector<8x48xbf16>
    %cst = arith.constant dense<0.000000e+00> : vector<256x48xf32>
    %2 = tpu.matmul %0, %1, %cst {dimension_numbers = #tpu.dot_dimension_numbers<[1], [0], [0], [1], [0, 0, 1, 1], [], []>} : vector<256x8xbf16>, vector<8x48xbf16>, vector<256x48xf32> -> vector<256x48xf32>
    %c0_3 = arith.constant 0 : index
    %c0_4 = arith.constant 0 : index
    %3 = vector.load %arg4[%c0_3, %c0_4] : memref<1x48xf32, #tpu.memory_space<vmem>>, vector<1x48xf32>
    %4 = vector.broadcast %3 : vector<1x48xf32> to vector<256x48xf32>
    %5 = arith.addf %2, %4 : vector<256x48xf32>
    %c0_5 = arith.constant 0 : index
    %c0_6 = arith.constant 0 : index
    %6 = vector.load %arg5[%c0_5, %c0_6] : memref<256x48xf32, #tpu.memory_space<vmem>>, vector<256x48xf32>
    tpu.vector_store %arg5[%c0_5, %c0_6], %5 {strides = array<i32>} : memref<256x48xf32, #tpu.memory_space<vmem>>, vector<256x48xf32>,
    return
  }
  func.func @transform_0(%arg0: i32, %arg1: i32) -> (i32, i32) {
    %c0_i32 = arith.constant 0 : i32
    %c0_i32_0 = arith.constant 0 : i32
    return %arg0, %c0_i32 : i32, i32
  }
  func.func @transform_1(%arg0: i32, %arg1: i32) -> (i32, i32) {
    %c0_i32 = arith.constant 0 : i32
    %c0_i32_0 = arith.constant 0 : i32
    return %c0_i32, %arg1 : i32, i32
  }
  func.func @transform_2(%arg0: i32, %arg1: i32) -> (i32, i32) {
    %c0_i32 = arith.constant 0 : i32
    %c0_i32_0 = arith.constant 0 : i32
    return %c0_i32, %arg1 : i32, i32
  }
  func.func @transform_3(%arg0: i32, %arg1: i32) -> (i32, i32) {
    %c0_i32 = arith.constant 0 : i32
    return %arg0, %arg1 : i32, i32
  }
}

</mosaic_0001>

<bundles_post_ra>
// kernel: _pallas_matmul.1
= control target key start
LH: loop header
LB: loop body
LE: loop exit
PB: predicated region body
PF: predicated region fallthrough
CT: control target
= control target key end

     0   :  { %8 = vsyncpa [#allocation3], 0  ;;  %s856_s12 = smov 0   ;;  %s858_s13 = smov 0   ;;  %s1034_s0 = inlined_call_operand.vmem [shape: bf16[4096,8], index: 0, kind: input, shape index: {}]   ;;  %s1035_s1 = inlined_call_operand.vmem [shape: bf16[8,48], index: 1, kind: input, shape index: {}]   ;;  %s1036_s2 = inlined_call_operand.hbm [shape: f32[1,48], index: 2, kind: input, shape index: {}]   ;;  %s1037_s3 = inlined_call_operand.vmem [shape: f32[4096,48], index: 3, kind: output, shape index: {}]  }
   0x1   :  { %s860_s14 = smov 0  }
   0x2 LB: > { %s628_s15 = sadd.s32 4294967295, %s833_s14   ;;  %s26_s16 = sadd.s32 1, %s829_s13  ;;  %s833_s14 = sphi %s860_s14, %s14_s14   ;;  %s829_s13 = sphi %s858_s13, %s1039_s13   ;;  %s825_s12 = sphi %s856_s12, %s1038_s12  }
   0x3   : > { %p28_p0 = scmp.ge.s32.totalorder %s26_s16, 16  ;;  %p630_p1 = scmp.ge.s32.totalorder %s833_s14, 1 }
   0x4   : > { %p137_p2 = scmp.lt.s32.totalorder %s833_s14, 17  ;;  %p749_p4 = scmp.eq.s32.totalorder %s628_s15, 0 }
   0x5   : > { %s1041_s16 = smov (%p28_p0, %s26_s16), 0  ;;  %s157_s19 = sshll.u32 %s1036_s2, 4  ;;  %s158_s19 = int_to_ptr.hbm [resolvable:$true] %s157_s19 }
   0x6   : > { %p138_p3 = pnand %p630_p1, %p137_p2  ;;  %s835_s20 = smov [#allocation2]  }
   0x7   : > { %s159_s21 = sshll.u32 %s835_s20, 4  ;;  %s160_s21 = int_to_ptr.vmem [resolvable:$true] %s159_s21 }
   0x8   : > { %p745_p5 = pneg %p138_p3  ;;  %181 = sbr.rel (%p138_p3) target bundleno = 215 (0xd7), region = 32 }
   0xa   : > { %p746_p6 = pnand %p749_p4, %p745_p5 }
   0xc   : > { %748 = dma.hbm_to_vmem [thread:$0]  (!%p746_p6), %s158_s19, 16, %s160_s21, [#allocation3]  }
   0xd   : > { %820 = dma.done.wait (%p749_p4), [#allocation3], 16  }
   0xe   : > { %822 = vsyncadd (%p749_p4), [#allocation3], 4294967280  ;;  %s636_s22 = sshll.u32 %s825_s12, 5  ;;  %vm399_vm0 = vcmask 1043456   ;;  %v265_v0 = vld [vmem:[%s1035_s1] sm:$0xf] }
   0xf   : > { %p214_p7 = scmp.lt.s32.totalorder %s636_s22, 511  ;;  %v401_v1 = vsel %vm399_vm0, %v265_v0, 0  ;;  %vm350_vm1 = vcmask 64512   ;;  %v922_v18 = vld [vmem:[#allocation2] ss:$0 sm:$0xff]  ;;  %vm492_vm2 = vcmask 392192  }
  0x10   : > { %410 = vmatpush.bf16.msra.mxu0 %v401_v1  ;;  %738 = vmatpush.bf16.msra.mxu1 %v401_v1 }
  0x11   : > { %s1043_s22 = smov (!%p214_p7, %s636_s22), 511  ;;  %739 = vmatpush.bf16.msra.mxu2 %v401_v1  ;;  %740 = vmatpush.bf16.msra.mxu3 %v401_v1 }
  0x12   : > { %s637_s23 = sshll.u32 %s1043_s22, 2  ;;  %s639_s29 = sshll.u32 %s1043_s22, 3 }
  0x13   : > { %s884_s26 = scalar_lea.vmem %s1034_s0, %s637_s23  ;;  %s927_s5 = scalar_lea.vmem %s1037_s3, %s639_s29 }
  0x14   : > { %v722_v2 = vld [vmem:[%s884_s26] sm:$0xff]  ;;  %v723_v6 = vld [vmem:[%s884_s26 + $0x8] sm:$0xff]  ;;  %v724_v10 = vld [vmem:[%s884_s26 + $0x10] sm:$0xff] }
  0x15   : > { %v726_v3 = vld [vmem:[%s884_s26 + $0x20] sm:$0xff]  ;;  %704 = vmatmul.msk.bf16.vlgmr.msra.gmra.mxu0 %vm350_vm1, %v722_v2  ;;  %v727_v7 = vld [vmem:[%s884_s26 + $0x28] sm:$0xff]  ;;  %v728_v11 = vld [vmem:[%s884_s26 + $0x30] sm:$0xff] }
  0x16   : > { %v730_v4 = vld [vmem:[%s884_s26 + $0x40] sm:$0xff]  ;;  %708 = vmatmul.msk.bf16.vlgmr.msra.gmra.mxu1 %vm350_vm1, %v726_v3  ;;  %v731_v8 = vld [vmem:[%s884_s26 + $0x48] sm:$0xff]  ;;  %v732_v12 = vld [vmem:[%s884_s26 + $0x50] sm:$0xff] }
  0x17   : > { %v734_v5 = vld [vmem:[%s884_s26 + $0x60] sm:$0xff]  ;;  %712 = vmatmul.msk.bf16.vlgmr.msra.gmra.mxu2 %vm350_vm1, %v730_v4  ;;  %v735_v9 = vld [vmem:[%s884_s26 + $0x68] sm:$0xff]  ;;  %v736_v13 = vld [vmem:[%s884_s26 + $0x70] sm:$0xff] }
  0x18   : > { %716 = vmatmul.msk.bf16.vlgmr.msra.gmra.mxu3 %vm350_vm1, %v734_v5  ;;  %v725_v14 = vld [vmem:[%s884_s26 + $0x18] sm:$0xff] }
  0x19   : > { %v729_v15 = vld [vmem:[%s884_s26 + $0x38] sm:$0xff] }
  0x1a   : > { %v733_v16 = vld [vmem:[%s884_s26 + $0x58] sm:$0xff] }
  0x1b   : > { %v737_v17 = vld [vmem:[%s884_s26 + $0x78] sm:$0xff] }
  0x25   : > { %705 = vmatmul.msk.bf16.gmra.mxu0 %vm350_vm1, %v723_v6 }
  0x26   : > { %709 = vmatmul.msk.bf16.gmra.mxu1 %vm350_vm1, %v727_v7 }
  0x27   : > { %713 = vmatmul.msk.bf16.gmra.mxu2 %vm350_vm1, %v731_v8 }
  0x28   : > { %717 = vmatmul.msk.bf16.gmra.mxu3 %vm350_vm1, %v735_v9 }
  0x35   : > { %706 = vmatmul.msk.bf16.gmra.mxu0 %vm350_vm1, %v724_v10 }
  0x36   : > { %710 = vmatmul.msk.bf16.gmra.mxu1 %vm350_vm1, %v728_v11 }
  0x37   : > { %714 = vmatmul.msk.bf16.gmra.mxu2 %vm350_vm1, %v732_v12 }
  0x38   : > { %718 = vmatmul.msk.bf16.gmra.mxu3 %vm350_vm1, %v736_v13 }
  0x45   : > { %707 = vmatmul.msk.bf16.gmra.mxu0 %vm350_vm1, %v725_v14 }
  0x46   : > { %711 = vmatmul.msk.bf16.gmra.mxu1 %vm350_vm1, %v729_v15 }
  0x47   : > { %715 = vmatmul.msk.bf16.gmra.mxu2 %vm350_vm1, %v733_v16 }
  0x48   : > { %719 = vmatmul.msk.bf16.gmra.mxu3 %vm350_vm1, %v737_v17 }
  0x92   : > { %v412_v19 = vpop.f32.mrf.mxu0 }
  0x93   : > { %v432_v20 = vpop.f32.mrf.mxu1  ;;  %v413_v21 = vadd.f32 %v922_v18, %v412_v19 }
  0x94   : > { %v433_v22 = vadd.f32 %v922_v18, %v432_v20 }
  0x95   : > { %493 = vst.msk [vmem:[%s927_s5] sm:$0xff] %vm492_vm2, %v413_v21 }
  0x96   : > { %501 = vst.msk [vmem:[%s927_s5 + $0x40] sm:$0xff] %vm492_vm2, %v433_v22 }
  0x9a   : > { %v452_v23 = vpop.f32.mrf.mxu2  ;;  %v414_v27 = vpop.f32.mrf.mxu0 }
  0x9b   : > { %v472_v24 = vpop.f32.mrf.mxu3  ;;  %v453_v25 = vadd.f32 %v922_v18, %v452_v23  ;;  %v434_v28 = vpop.f32.mrf.mxu1  ;;  %v415_v29 = vadd.f32 %v922_v18, %v414_v27 }
  0x9c   : > { %v473_v26 = vadd.f32 %v922_v18, %v472_v24  ;;  %v435_v30 = vadd.f32 %v922_v18, %v434_v28 }
  0x9d   : > { %509 = vst.msk [vmem:[%s927_s5 + $0x80] sm:$0xff] %vm492_vm2, %v453_v25 }
  0x9e   : > { %517 = vst.msk [vmem:[%s927_s5 + $0xc0] sm:$0xff] %vm492_vm2, %v473_v26 }
  0x9f   : > { %494 = vst.msk [vmem:[%s927_s5 + $0x8] sm:$0xff] %vm492_vm2, %v415_v29 }
  0xa0   : > { %502 = vst.msk [vmem:[%s927_s5 + $0x48] sm:$0xff] %vm492_vm2, %v435_v30 }
  0xa2   : > { %v454_v31 = vpop.f32.mrf.mxu2  ;;  %v417_v35 = vpop.f32.mrf.mxu0 }
  0xa3   : > { %v474_v32 = vpop.f32.mrf.mxu3  ;;  %v455_v33 = vadd.f32 %v922_v18, %v454_v31  ;;  %v437_v36 = vpop.f32.mrf.mxu1  ;;  %v418_v37 = vadd.f32 %v922_v18, %v417_v35 }
  0xa4   : > { %v475_v34 = vadd.f32 %v922_v18, %v474_v32  ;;  %v438_v38 = vadd.f32 %v922_v18, %v437_v36 }
  0xa5   : > { %510 = vst.msk [vmem:[%s927_s5 + $0x88] sm:$0xff] %vm492_vm2, %v455_v33 }
  0xa6   : > { %518 = vst.msk [vmem:[%s927_s5 + $0xc8] sm:$0xff] %vm492_vm2, %v475_v34 }
  0xa7   : > { %495 = vst.msk [vmem:[%s927_s5 + $0x10] sm:$0xff] %vm492_vm2, %v418_v37 }
  0xa8   : > { %503 = vst.msk [vmem:[%s927_s5 + $0x50] sm:$0xff] %vm492_vm2, %v438_v38 }
  0xaa   : > { %v457_v39 = vpop.f32.mrf.mxu2  ;;  %v419_v43 = vpop.f32.mrf.mxu0 }
  0xab   : > { %v477_v40 = vpop.f32.mrf.mxu3  ;;  %v458_v41 = vadd.f32 %v922_v18, %v457_v39  ;;  %v439_v44 = vpop.f32.mrf.mxu1  ;;  %v420_v45 = vadd.f32 %v922_v18, %v419_v43 }
  0xac   : > { %v478_v42 = vadd.f32 %v922_v18, %v477_v40  ;;  %v440_v46 = vadd.f32 %v922_v18, %v439_v44 }
  0xad   : > { %511 = vst.msk [vmem:[%s927_s5 + $0x90] sm:$0xff] %vm492_vm2, %v458_v41 }
  0xae   : > { %519 = vst.msk [vmem:[%s927_s5 + $0xd0] sm:$0xff] %vm492_vm2, %v478_v42 }
  0xaf   : > { %496 = vst.msk [vmem:[%s927_s5 + $0x18] sm:$0xff] %vm492_vm2, %v420_v45 }
  0xb0   : > { %504 = vst.msk [vmem:[%s927_s5 + $0x58] sm:$0xff] %vm492_vm2, %v440_v46 }
  0xb2   : > { %v459_v47 = vpop.f32.mrf.mxu2  ;;  %v422_v51 = vpop.f32.mrf.mxu0 }
  0xb3   : > { %v479_v48 = vpop.f32.mrf.mxu3  ;;  %v460_v49 = vadd.f32 %v922_v18, %v459_v47  ;;  %v442_v52 = vpop.f32.mrf.mxu1  ;;  %v423_v53 = vadd.f32 %v922_v18, %v422_v51 }
  0xb4   : > { %v480_v50 = vadd.f32 %v922_v18, %v479_v48  ;;  %v443_v54 = vadd.f32 %v922_v18, %v442_v52 }
  0xb5   : > { %512 = vst.msk [vmem:[%s927_s5 + $0x98] sm:$0xff] %vm492_vm2, %v460_v49 }
  0xb6   : > { %520 = vst.msk [vmem:[%s927_s5 + $0xd8] sm:$0xff] %vm492_vm2, %v480_v50 }
  0xb7   : > { %497 = vst.msk [vmem:[%s927_s5 + $0x20] sm:$0xff] %vm492_vm2, %v423_v53 }
  0xb8   : > { %505 = vst.msk [vmem:[%s927_s5 + $0x60] sm:$0xff] %vm492_vm2, %v443_v54 }
  0xba   : > { %v462_v55 = vpop.f32.mrf.mxu2  ;;  %v424_v59 = vpop.f32.mrf.mxu0 }
  0xbb   : > { %v482_v56 = vpop.f32.mrf.mxu3  ;;  %v463_v57 = vadd.f32 %v922_v18, %v462_v55  ;;  %v444_v60 = vpop.f32.mrf.mxu1  ;;  %v425_v61 = vadd.f32 %v922_v18, %v424_v59 }
  0xbc   : > { %v483_v58 = vadd.f32 %v922_v18, %v482_v56  ;;  %v445_v62 = vadd.f32 %v922_v18, %v444_v60 }
  0xbd   : > { %513 = vst.msk [vmem:[%s927_s5 + $0xa0] sm:$0xff] %vm492_vm2, %v463_v57 }
  0xbe   : > { %521 = vst.msk [vmem:[%s927_s5 + $0xe0] sm:$0xff] %vm492_vm2, %v483_v58 }
  0xbf   : > { %498 = vst.msk [vmem:[%s927_s5 + $0x28] sm:$0xff] %vm492_vm2, %v425_v61 }
  0xc0   : > { %506 = vst.msk [vmem:[%s927_s5 + $0x68] sm:$0xff] %vm492_vm2, %v445_v62 }
  0xc2   : > { %v464_v63 = vpop.f32.mrf.mxu2  ;;  %v427_v3 = vpop.f32.mrf.mxu0 }
  0xc3   : > { %v484_v0 = vpop.f32.mrf.mxu3  ;;  %v465_v1 = vadd.f32 %v922_v18, %v464_v63  ;;  %v447_v4 = vpop.f32.mrf.mxu1  ;;  %v428_v5 = vadd.f32 %v922_v18, %v427_v3 }
  0xc4   : > { %v485_v2 = vadd.f32 %v922_v18, %v484_v0  ;;  %v448_v6 = vadd.f32 %v922_v18, %v447_v4 }
  0xc5   : > { %514 = vst.msk [vmem:[%s927_s5 + $0xa8] sm:$0xff] %vm492_vm2, %v465_v1 }
  0xc6   : > { %522 = vst.msk [vmem:[%s927_s5 + $0xe8] sm:$0xff] %vm492_vm2, %v485_v2 }
  0xc7   : > { %499 = vst.msk [vmem:[%s927_s5 + $0x30] sm:$0xff] %vm492_vm2, %v428_v5 }
  0xc8   : > { %507 = vst.msk [vmem:[%s927_s5 + $0x70] sm:$0xff] %vm492_vm2, %v448_v6 }
  0xca   : > { %v467_v7 = vpop.f32.mrf.mxu2  ;;  %v429_v11 = vpop.f32.mrf.mxu0 }
  0xcb   : > { %v487_v8 = vpop.f32.mrf.mxu3  ;;  %v468_v9 = vadd.f32 %v922_v18, %v467_v7  ;;  %v449_v12 = vpop.f32.mrf.mxu1  ;;  %v430_v13 = vadd.f32 %v922_v18, %v429_v11 }
  0xcc   : > { %v488_v10 = vadd.f32 %v922_v18, %v487_v8  ;;  %v450_v14 = vadd.f32 %v922_v18, %v449_v12 }
  0xcd   : > { %515 = vst.msk [vmem:[%s927_s5 + $0xb0] sm:$0xff] %vm492_vm2, %v468_v9 }
  0xce   : > { %523 = vst.msk [vmem:[%s927_s5 + $0xf0] sm:$0xff] %vm492_vm2, %v488_v10 }
  0xcf   : > { %500 = vst.msk [vmem:[%s927_s5 + $0x38] sm:$0xff] %vm492_vm2, %v430_v13 }
  0xd0   : > { %508 = vst.msk [vmem:[%s927_s5 + $0x78] sm:$0xff] %vm492_vm2, %v450_v14 }
  0xd2   : > { %v469_v15 = vpop.f32.mrf.mxu2 }
  0xd3   : > { %v489_v16 = vpop.f32.mrf.mxu3  ;;  %v470_v17 = vadd.f32 %v922_v18, %v469_v15 }
  0xd4   : > { %v490_v19 = vadd.f32 %v922_v18, %v489_v16 }
  0xd5   : > { %516 = vst.msk [vmem:[%s927_s5 + $0xb8] sm:$0xff] %vm492_vm2, %v470_v17 }
  0xd6   : > { %524 = vst.msk [vmem:[%s927_s5 + $0xf8] sm:$0xff] %vm492_vm2, %v490_v19 }
  0xd7 PF: > { %s14_s14 = sadd.s32 1, %s833_s14   ;;  %s1038_s12 = smov %s829_s13 }
  0xd8   : > { %p11_p8 = scmp.ge.s32.totalorder %s14_s14, 18   ;;  %s1039_s13 = smov %s1041_s16 }
  0xda   :  { %13 = sbr.rel (!%p11_p8) target bundleno = 2 (0x2), region = 71 }
  0xdf   :  { %553 = vsyncpa [#allocation3], 1 }
  0xe0   :  { %555 = vsyncpa [#allocation3 + $0x1], 1 }

</bundles_post_ra>
